<compile_context>
chip_gen: v7x
topology: tpu7x:2x2x1
jax: 0.10.0
libtpu: 0.0.40
codegen_flags: <defaults>
</compile_context>

<pallas_src>
import jax
import jax.numpy as jnp
from jax.experimental import pallas as pl
from jax.experimental.pallas import tpu as pltpu


# ----------------------------- Pallas kernel --------------------------------
def _spectral_contract_kernel(x_ref, w_ref, o_ref):
    """Pointwise-in-mode complex contraction over input channels.

      out[b, o, m] += sum_i x[b, i, m] * w[i, o, m]      (complex)

    Layout (all f32):
      x_ref : (bm, bc, 2*Mpad)       lanes = [xr | xi]
      w_ref : (bc, bo, 2*Mpad)       lanes = [wr | wi]
      o_ref : (bm, bo, 2*Mpad)       lanes = [or | oi], resident across the
                                     Cin grid axis (last, "arbitrary").
    Naive 4-mult complex product (no Gauss planes -> 1/3 less weight traffic).
    """
    mpad = x_ref.shape[-1] // 2          # multiple of 128 -> aligned lane slices
    bc = x_ref.shape[1]
    k = pl.program_id(2)

    acc_r = jnp.zeros((x_ref.shape[0], w_ref.shape[1], mpad), jnp.float32)
    acc_i = jnp.zeros_like(acc_r)
    for i in range(bc):                  # static small tile -> unrolled, bounded
        xr = x_ref[:, i, :mpad]          # (bm, Mpad)
        xi = x_ref[:, i, mpad:]
        wr = w_ref[i, :, :mpad]          # (bo, Mpad)
        wi = w_ref[i, :, mpad:]
        acc_r = acc_r + (xr[:, None, :] * wr[None, :, :]
                         - xi[:, None, :] * wi[None, :, :])
        acc_i = acc_i + (xr[:, None, :] * wi[None, :, :]
                         + xi[:, None, :] * wr[None, :, :])

    @pl.when(k == 0)
    def _():                             # first Cin tile: overwrite
        o_ref[:, :, :mpad] = acc_r
        o_ref[:, :, mpad:] = acc_i

    @pl.when(k != 0)
    def _():                             # later Cin tiles: accumulate in place
        o_ref[:, :, :mpad] += acc_r
        o_ref[:, :, mpad:] += acc_i


def spectral_contract(x_packed, w_packed, *, bm=None, bo=None, bc=None):
    """One Pallas call: complex 'bim,iom->bom' on real/imag lane-packed planes.

    x_packed : (B, Cin, 2*Mpad) f32      w_packed : (Cin, Cout_pad, 2*Mpad) f32
    Returns  : (B, Cout_pad, 2*Mpad) f32
    """
    B, Cin, L = x_packed.shape
    Cin_w, Cout_pad, Lw = w_packed.shape
    assert Cin == Cin_w and L == Lw and L % 256 == 0 and Cout_pad % 8 == 0

    # >=2 parallel grid iterations so v7x can shard across its 2 TensorCores.
    if bm is None:
        bm = max(1, pl.cdiv(B, 2))
        if B % bm:
            bm = 1
    if bo is None:
        bo = Cout_pad
    if bc is None:
        bc = Cin if (Cin <= 8 or Cin % 8) else 8
    assert B % bm == 0 and Cout_pad % bo == 0 and Cin % bc == 0

    grid = (B // bm, Cout_pad // bo, Cin // bc)

    x_spec = pl.BlockSpec((bm, bc, L), lambda b, o, k: (b, k, 0))
    w_spec = pl.BlockSpec((bc, bo, L), lambda b, o, k: (k, o, 0))
    o_spec = pl.BlockSpec((bm, bo, L), lambda b, o, k: (b, o, 0))

    # Explicit VMEM budget (double-buffered x/w/out blocks + headroom); keeps
    # the request well inside v7x's 64 MiB physical VMEM.
    blk_bytes = 4 * L * (bm * bc + bc * bo + bm * bo) * 2
    vmem_limit = int(min(max(2 * blk_bytes, 16 * 1024 * 1024), 32 * 1024 * 1024))

    # TODO(synk): for very large Mpad, split real/imag into separate streams to
    # enable a mode-tile grid axis (the contraction is pointwise in m).
    return pl.pallas_call(
        _spectral_contract_kernel,
        out_shape=jax.ShapeDtypeStruct((B, Cout_pad, L), jnp.float32),
        grid=grid,
        in_specs=[x_spec, w_spec],
        out_specs=o_spec,
        compiler_params=pltpu.CompilerParams(
            dimension_semantics=("parallel", "parallel", "arbitrary"),
            vmem_limit_bytes=vmem_limit),
    )(x_packed, w_packed)


# ----------------------------- Weight preprocessing --------------------------
def prepare_spectral_weights(w0, w1, *, lane_pad=128, sublane_pad=8):
    """Pack the two complex corner weights ONCE (static across forwards).

    Returns one f32 array of shape (Cin, Cout_pad, 2*Mpad) with lane layout
    [wr(top, bot, 0-pad) | wi(top, bot, 0-pad)].  Padded mode lanes and padded
    Cout rows are ZERO so they contribute nothing to the contraction.
    """
    Cin, Cout, hm_h, hm_w = w0.shape
    M = hm_h * hm_w
    Mtot = 2 * M
    Mpad = -(-Mtot // lane_pad) * lane_pad
    Cout_pad = -(-Cout // sublane_pad) * sublane_pad

    wr = jnp.concatenate([jnp.real(w0).reshape(Cin, Cout, M),
                          jnp.real(w1).reshape(Cin, Cout, M)], axis=-1)
    wi = jnp.concatenate([jnp.imag(w0).reshape(Cin, Cout, M),
                          jnp.imag(w1).reshape(Cin, Cout, M)], axis=-1)
    pad = ((0, 0), (0, Cout_pad - Cout), (0, Mpad - Mtot))
    wr = jnp.pad(wr.astype(jnp.float32), pad)
    wi = jnp.pad(wi.astype(jnp.float32), pad)
    return jnp.concatenate([wr, wi], axis=-1)        # (Cin, Cout_pad, 2*Mpad)


# ----------------------------- Forward wrapper -------------------------------
def factorized_spectral_conv2d(x, w_packed, bias, out_channels,
                               half_modes_h, half_modes_w, fft_norm="backward"):
    """x: (B, Cin, H, W) float32 (NCHW).  w_packed: prepare_spectral_weights(...).
    bias: (n_layers, Cout, 1, 1) float32 or None.  Returns (B, Cout, H, W)."""
    B, Cin, H, W = x.shape
    Cout = out_channels
    hm_h, hm_w = half_modes_h, half_modes_w
    Wf = W // 2 + 1
    M = hm_h * hm_w
    Mtot = 2 * M
    Cout_pad = w_packed.shape[1]
    Mpad = w_packed.shape[2] // 2
    assert w_packed.shape[0] == Cin
    assert hm_h <= H // 2, "half_modes_h must be <= H//2 (corner overlap)"
    assert hm_w <= Wf, "half_modes_w must be <= W//2 + 1"

    xf = jnp.fft.rfft2(x.astype(jnp.float32), norm=fft_norm)    # (B, Cin, H, Wf)

    # Pack both frequency corners onto the lane axis, zero-pad to Mpad, and
    # concatenate real|imag -> a single lane-dense kernel input.
    top = xf[:, :, :hm_h, :hm_w].reshape(B, Cin, M)
    bot = xf[:, :, H - hm_h:, :hm_w].reshape(B, Cin, M)
    xc = jnp.concatenate([top, bot], axis=-1)                   # (B, Cin, Mtot)
    lane_pad = ((0, 0), (0, 0), (0, Mpad - Mtot))
    xr = jnp.pad(jnp.real(xc).astype(jnp.float32), lane_pad)
    xi = jnp.pad(jnp.imag(xc).astype(jnp.float32), lane_pad)
    x_packed = jnp.concatenate([xr, xi], axis=-1)               # (B, Cin, 2*Mpad)

    o_packed = spectral_contract(x_packed, w_packed)            # (B, Cout_pad, 2*Mpad)

    o_r = o_packed[:, :Cout, :Mtot].reshape(B, Cout, 2, hm_h, hm_w)
    o_i = o_packed[:, :Cout, Mpad:Mpad + Mtot].reshape(B, Cout, 2, hm_h, hm_w)
    out_c = jax.lax.complex(o_r, o_i)                           # complex64

    # Assemble the full spectrum (pad + concat; no zeros+scatter).
    # TODO(synk): writing the corner blocks in place from the kernel would save
    # these passes, but the corner blocks (hm_h, Wf) violate the (8,128) block
    # constraint at small mode counts and would re-introduce masked stores.
    pad_w = Wf - hm_w
    top_blk = jnp.pad(out_c[:, :, 0], ((0, 0), (0, 0), (0, 0), (0, pad_w)))
    bot_blk = jnp.pad(out_c[:, :, 1], ((0, 0), (0, 0), (0, 0), (0, pad_w)))
    mid = jnp.zeros((B, Cout, H - 2 * hm_h, Wf), dtype=out_c.dtype)
    out_fft = jnp.concatenate([top_blk, mid, bot_blk], axis=2)  # (B, Cout, H, Wf)

    y = jnp.fft.irfft2(out_fft, s=(H, W), norm=fft_norm)        # (B, Cout, H, W)
    if bias is not None:
        y = y + bias[0]                                         # indices = 0
    return y


# ----------------------------- Reference (pure JAX) ---------------------------
def _reference(x, w0, w1, bias, hm_h, hm_w, fft_norm="backward"):
    B, Cin, H, W = x.shape
    Cout = w0.shape[1]
    xf = jnp.fft.rfft2(x.astype(jnp.float32), norm=fft_norm)
    out_fft = jnp.zeros((B, Cout, H, W // 2 + 1), dtype=jnp.complex64)
    top = jnp.einsum('bihw,iohw->bohw', xf[:, :, :hm_h, :hm_w], w0)
    bot = jnp.einsum('bihw,iohw->bohw', xf[:, :, H - hm_h:, :hm_w], w1)
    out_fft = out_fft.at[:, :, :hm_h, :hm_w].set(top)
    out_fft = out_fft.at[:, :, H - hm_h:, :hm_w].set(bot)
    y = jnp.fft.irfft2(out_fft, s=(H, W), norm=fft_norm)
    return y + bias[0]


# ----------------------------------- Main -------------------------------------
if __name__ == "__main__":
    # Module config: in_channels=4, out_channels=4, modes_height=8, modes_width=8
    B, Cin, Cout, H, W = 2, 4, 4, 16, 16
    modes_h, modes_w = 8, 8
    hm_h, hm_w = modes_h // 2, modes_w // 2          # half_modes
    n_layers = 1
    scale = 1.0 / (Cin * Cout)                       # scale='auto'

    key = jax.random.PRNGKey(0)
    kx, kw0r, kw0i, kw1r, kw1i, kb = jax.random.split(key, 6)

    x = jax.random.normal(kx, (B, Cin, H, W), dtype=jnp.float32)

    # Dense ('reconstructed') complex weights, std = scale.  Two weights: one per
    # (top / bottom) frequency block (2**(order-1) * n_layers = 2).
    w0 = (scale * jax.random.normal(kw0r, (Cin, Cout, hm_h, hm_w))
          + 1j * scale * jax.random.normal(kw0i, (Cin, Cout, hm_h, hm_w))
          ).astype(jnp.complex64)
    w1 = (scale * jax.random.normal(kw1r, (Cin, Cout, hm_h, hm_w))
          + 1j * scale * jax.random.normal(kw1i, (Cin, Cout, hm_h, hm_w))
          ).astype(jnp.complex64)
    bias = scale * jax.random.normal(kb, (n_layers, Cout, 1, 1), dtype=jnp.float32)

    # TODO(synk): CP/Tucker/TT factorized contraction paths ('factorized'
    # implementation) are not reproduced; only the dense reconstructed path is.

    # Weight split / lane-pad / Cout-pad hoisted out of the forward path.
    w_packed = prepare_spectral_weights(w0, w1)

    fwd = jax.jit(lambda a: factorized_spectral_conv2d(a, w_packed, bias,
                                                       Cout, hm_h, hm_w))
    y = jax.block_until_ready(fwd(x))

    y_ref = _reference(x, w0, w1, bias, hm_h, hm_w)
    assert y.shape == (B, Cout, H, W)
    assert jnp.allclose(y, y_ref, atol=1e-5, rtol=1e-5), "mismatch vs reference"

    print("KERNEL_OK")
</pallas_src>

<mosaic_0001>
module attributes {stable_mosaic.version = 11 : i64} {
  func.func @_spectral_contract_kernel(%arg0: i32, %arg1: i32, %arg2: i32, %arg3: memref<1x4x256xf32, #tpu.memory_space<vmem>>, %arg4: memref<4x8x256xf32, #tpu.memory_space<vmem>>, %arg5: memref<1x8x256xf32, #tpu.memory_space<vmem>>) attributes {dimension_semantics = [#tpu.dimension_semantics<parallel>, #tpu.dimension_semantics<parallel>, #tpu.dimension_semantics<arbitrary>], iteration_bounds = array<i64: 2, 1, 1>, scalar_prefetch = 0 : i64, scratch_operands = 0 : i64, tpu.core_type = #tpu.core_type<tc>, window_params = [{transform_indices = @transform_0, window_bounds = array<i64: 1, 4, 256>}, {transform_indices = @transform_1, window_bounds = array<i64: 4, 8, 256>}, {transform_indices = @transform_2, window_bounds = array<i64: 1, 8, 256>}]} {
    %cst = arith.constant 0.000000e+00 : f32
    %0 = vector.broadcast %cst : f32 to vector<1x8x128xf32>
    %cst_0 = arith.constant 0.000000e+00 : f32
    %1 = vector.broadcast %cst_0 : f32 to vector<1x8x128xf32>
    %c0 = arith.constant 0 : index
    %c0_1 = arith.constant 0 : index
    %c0_2 = arith.constant 0 : index
    %2 = vector.load %arg3[%c0, %c0_1, %c0_2] : memref<1x4x256xf32, #tpu.memory_space<vmem>>, vector<1x1x128xf32>
    %3 = vector.shape_cast %2 : vector<1x1x128xf32> to vector<1x128xf32>
    %c0_3 = arith.constant 0 : index
    %c0_4 = arith.constant 0 : index
    %c128 = arith.constant 128 : index
    %4 = vector.load %arg3[%c0_3, %c0_4, %c128] : memref<1x4x256xf32, #tpu.memory_space<vmem>>, vector<1x1x128xf32>
    %5 = vector.shape_cast %4 : vector<1x1x128xf32> to vector<1x128xf32>
    %c0_5 = arith.constant 0 : index
    %c0_6 = arith.constant 0 : index
    %c0_7 = arith.constant 0 : index
    %6 = vector.load %arg4[%c0_5, %c0_6, %c0_7] : memref<4x8x256xf32, #tpu.memory_space<vmem>>, vector<1x8x128xf32>
    %7 = vector.shape_cast %6 : vector<1x8x128xf32> to vector<8x128xf32>
    %c0_8 = arith.constant 0 : index
    %c0_9 = arith.constant 0 : index
    %c128_10 = arith.constant 128 : index
    %8 = vector.load %arg4[%c0_8, %c0_9, %c128_10] : memref<4x8x256xf32, #tpu.memory_space<vmem>>, vector<1x8x128xf32>
    %9 = vector.shape_cast %8 : vector<1x8x128xf32> to vector<8x128xf32>
    %10 = vector.shape_cast %3 : vector<1x128xf32> to vector<1x1x128xf32>
    %11 = vector.shape_cast %7 : vector<8x128xf32> to vector<1x8x128xf32>
    %12 = vector.broadcast %10 : vector<1x1x128xf32> to vector<1x8x128xf32>
    %13 = arith.mulf %12, %11 : vector<1x8x128xf32>
    %14 = vector.shape_cast %5 : vector<1x128xf32> to vector<1x1x128xf32>
    %15 = vector.shape_cast %9 : vector<8x128xf32> to vector<1x8x128xf32>
    %16 = vector.broadcast %14 : vector<1x1x128xf32> to vector<1x8x128xf32>
    %17 = arith.mulf %16, %15 : vector<1x8x128xf32>
    %18 = arith.subf %13, %17 : vector<1x8x128xf32>
    %19 = arith.addf %0, %18 : vector<1x8x128xf32>
    %20 = vector.shape_cast %3 : vector<1x128xf32> to vector<1x1x128xf32>
    %21 = vector.shape_cast %9 : vector<8x128xf32> to vector<1x8x128xf32>
    %22 = vector.broadcast %20 : vector<1x1x128xf32> to vector<1x8x128xf32>
    %23 = arith.mulf %22, %21 : vector<1x8x128xf32>
    %24 = vector.shape_cast %5 : vector<1x128xf32> to vector<1x1x128xf32>
    %25 = vector.shape_cast %7 : vector<8x128xf32> to vector<1x8x128xf32>
    %26 = vector.broadcast %24 : vector<1x1x128xf32> to vector<1x8x128xf32>
    %27 = arith.mulf %26, %25 : vector<1x8x128xf32>
    %28 = arith.addf %23, %27 : vector<1x8x128xf32>
    %29 = arith.addf %1, %28 : vector<1x8x128xf32>
    %c0_11 = arith.constant 0 : index
    %c1 = arith.constant 1 : index
    %c0_12 = arith.constant 0 : index
    %30 = vector.load %arg3[%c0_11, %c1, %c0_12] : memref<1x4x256xf32, #tpu.memory_space<vmem>>, vector<1x1x128xf32>
    %31 = vector.shape_cast %30 : vector<1x1x128xf32> to vector<1x128xf32>
    %c0_13 = arith.constant 0 : index
    %c1_14 = arith.constant 1 : index
    %c128_15 = arith.constant 128 : index
    %32 = vector.load %arg3[%c0_13, %c1_14, %c128_15] : memref<1x4x256xf32, #tpu.memory_space<vmem>>, vector<1x1x128xf32>
    %33 = vector.shape_cast %32 : vector<1x1x128xf32> to vector<1x128xf32>
    %c1_16 = arith.constant 1 : index
    %c0_17 = arith.constant 0 : index
    %c0_18 = arith.constant 0 : index
    %34 = vector.load %arg4[%c1_16, %c0_17, %c0_18] : memref<4x8x256xf32, #tpu.memory_space<vmem>>, vector<1x8x128xf32>
    %35 = vector.shape_cast %34 : vector<1x8x128xf32> to vector<8x128xf32>
    %c1_19 = arith.constant 1 : index
    %c0_20 = arith.constant 0 : index
    %c128_21 = arith.constant 128 : index
    %36 = vector.load %arg4[%c1_19, %c0_20, %c128_21] : memref<4x8x256xf32, #tpu.memory_space<vmem>>, vector<1x8x128xf32>
    %37 = vector.shape_cast %36 : vector<1x8x128xf32> to vector<8x128xf32>
    %38 = vector.shape_cast %31 : vector<1x128xf32> to vector<1x1x128xf32>
    %39 = vector.shape_cast %35 : vector<8x128xf32> to vector<1x8x128xf32>
    %40 = vector.broadcast %38 : vector<1x1x128xf32> to vector<1x8x128xf32>
    %41 = arith.mulf %40, %39 : vector<1x8x128xf32>
    %42 = vector.shape_cast %33 : vector<1x128xf32> to vector<1x1x128xf32>
    %43 = vector.shape_cast %37 : vector<8x128xf32> to vector<1x8x128xf32>
    %44 = vector.broadcast %42 : vector<1x1x128xf32> to vector<1x8x128xf32>
    %45 = arith.mulf %44, %43 : vector<1x8x128xf32>
    %46 = arith.subf %41, %45 : vector<1x8x128xf32>
    %47 = arith.addf %19, %46 : vector<1x8x128xf32>
    %48 = vector.shape_cast %31 : vector<1x128xf32> to vector<1x1x128xf32>
    %49 = vector.shape_cast %37 : vector<8x128xf32> to vector<1x8x128xf32>
    %50 = vector.broadcast %48 : vector<1x1x128xf32> to vector<1x8x128xf32>
    %51 = arith.mulf %50, %49 : vector<1x8x128xf32>
    %52 = vector.shape_cast %33 : vector<1x128xf32> to vector<1x1x128xf32>
    %53 = vector.shape_cast %35 : vector<8x128xf32> to vector<1x8x128xf32>
    %54 = vector.broadcast %52 : vector<1x1x128xf32> to vector<1x8x128xf32>
    %55 = arith.mulf %54, %53 : vector<1x8x128xf32>
    %56 = arith.addf %51, %55 : vector<1x8x128xf32>
    %57 = arith.addf %29, %56 : vector<1x8x128xf32>
    %c0_22 = arith.constant 0 : index
    %c2 = arith.constant 2 : index
    %c0_23 = arith.constant 0 : index
    %58 = vector.load %arg3[%c0_22, %c2, %c0_23] : memref<1x4x256xf32, #tpu.memory_space<vmem>>, vector<1x1x128xf32>
    %59 = vector.shape_cast %58 : vector<1x1x128xf32> to vector<1x128xf32>
    %c0_24 = arith.constant 0 : index
    %c2_25 = arith.constant 2 : index
    %c128_26 = arith.constant 128 : index
    %60 = vector.load %arg3[%c0_24, %c2_25, %c128_26] : memref<1x4x256xf32, #tpu.memory_space<vmem>>, vector<1x1x128xf32>
    %61 = vector.shape_cast %60 : vector<1x1x128xf32> to vector<1x128xf32>
    %c2_27 = arith.constant 2 : index
    %c0_28 = arith.constant 0 : index
    %c0_29 = arith.constant 0 : index
    %62 = vector.load %arg4[%c2_27, %c0_28, %c0_29] : memref<4x8x256xf32, #tpu.memory_space<vmem>>, vector<1x8x128xf32>
    %63 = vector.shape_cast %62 : vector<1x8x128xf32> to vector<8x128xf32>
    %c2_30 = arith.constant 2 : index
    %c0_31 = arith.constant 0 : index
    %c128_32 = arith.constant 128 : index
    %64 = vector.load %arg4[%c2_30, %c0_31, %c128_32] : memref<4x8x256xf32, #tpu.memory_space<vmem>>, vector<1x8x128xf32>
    %65 = vector.shape_cast %64 : vector<1x8x128xf32> to vector<8x128xf32>
    %66 = vector.shape_cast %59 : vector<1x128xf32> to vector<1x1x128xf32>
    %67 = vector.shape_cast %63 : vector<8x128xf32> to vector<1x8x128xf32>
    %68 = vector.broadcast %66 : vector<1x1x128xf32> to vector<1x8x128xf32>
    %69 = arith.mulf %68, %67 : vector<1x8x128xf32>
    %70 = vector.shape_cast %61 : vector<1x128xf32> to vector<1x1x128xf32>
    %71 = vector.shape_cast %65 : vector<8x128xf32> to vector<1x8x128xf32>
    %72 = vector.broadcast %70 : vector<1x1x128xf32> to vector<1x8x128xf32>
    %73 = arith.mulf %72, %71 : vector<1x8x128xf32>
    %74 = arith.subf %69, %73 : vector<1x8x128xf32>
    %75 = arith.addf %47, %74 : vector<1x8x128xf32>
    %76 = vector.shape_cast %59 : vector<1x128xf32> to vector<1x1x128xf32>
    %77 = vector.shape_cast %65 : vector<8x128xf32> to vector<1x8x128xf32>
    %78 = vector.broadcast %76 : vector<1x1x128xf32> to vector<1x8x128xf32>
    %79 = arith.mulf %78, %77 : vector<1x8x128xf32>
    %80 = vector.shape_cast %61 : vector<1x128xf32> to vector<1x1x128xf32>
    %81 = vector.shape_cast %63 : vector<8x128xf32> to vector<1x8x128xf32>
    %82 = vector.broadcast %80 : vector<1x1x128xf32> to vector<1x8x128xf32>
    %83 = arith.mulf %82, %81 : vector<1x8x128xf32>
    %84 = arith.addf %79, %83 : vector<1x8x128xf32>
    %85 = arith.addf %57, %84 : vector<1x8x128xf32>
    %c0_33 = arith.constant 0 : index
    %c3 = arith.constant 3 : index
    %c0_34 = arith.constant 0 : index
    %86 = vector.load %arg3[%c0_33, %c3, %c0_34] : memref<1x4x256xf32, #tpu.memory_space<vmem>>, vector<1x1x128xf32>
    %87 = vector.shape_cast %86 : vector<1x1x128xf32> to vector<1x128xf32>
    %c0_35 = arith.constant 0 : index
    %c3_36 = arith.constant 3 : index
    %c128_37 = arith.constant 128 : index
    %88 = vector.load %arg3[%c0_35, %c3_36, %c128_37] : memref<1x4x256xf32, #tpu.memory_space<vmem>>, vector<1x1x128xf32>
    %89 = vector.shape_cast %88 : vector<1x1x128xf32> to vector<1x128xf32>
    %c3_38 = arith.constant 3 : index
    %c0_39 = arith.constant 0 : index
    %c0_40 = arith.constant 0 : index
    %90 = vector.load %arg4[%c3_38, %c0_39, %c0_40] : memref<4x8x256xf32, #tpu.memory_space<vmem>>, vector<1x8x128xf32>
    %91 = vector.shape_cast %90 : vector<1x8x128xf32> to vector<8x128xf32>
    %c3_41 = arith.constant 3 : index
    %c0_42 = arith.constant 0 : index
    %c128_43 = arith.constant 128 : index
    %92 = vector.load %arg4[%c3_41, %c0_42, %c128_43] : memref<4x8x256xf32, #tpu.memory_space<vmem>>, vector<1x8x128xf32>
    %93 = vector.shape_cast %92 : vector<1x8x128xf32> to vector<8x128xf32>
    %94 = vector.shape_cast %87 : vector<1x128xf32> to vector<1x1x128xf32>
    %95 = vector.shape_cast %91 : vector<8x128xf32> to vector<1x8x128xf32>
    %96 = vector.broadcast %94 : vector<1x1x128xf32> to vector<1x8x128xf32>
    %97 = arith.mulf %96, %95 : vector<1x8x128xf32>
    %98 = vector.shape_cast %89 : vector<1x128xf32> to vector<1x1x128xf32>
    %99 = vector.shape_cast %93 : vector<8x128xf32> to vector<1x8x128xf32>
    %100 = vector.broadcast %98 : vector<1x1x128xf32> to vector<1x8x128xf32>
    %101 = arith.mulf %100, %99 : vector<1x8x128xf32>
    %102 = arith.subf %97, %101 : vector<1x8x128xf32>
    %103 = arith.addf %75, %102 : vector<1x8x128xf32>
    %104 = vector.shape_cast %87 : vector<1x128xf32> to vector<1x1x128xf32>
    %105 = vector.shape_cast %93 : vector<8x128xf32> to vector<1x8x128xf32>
    %106 = vector.broadcast %104 : vector<1x1x128xf32> to vector<1x8x128xf32>
    %107 = arith.mulf %106, %105 : vector<1x8x128xf32>
    %108 = vector.shape_cast %89 : vector<1x128xf32> to vector<1x1x128xf32>
    %109 = vector.shape_cast %91 : vector<8x128xf32> to vector<1x8x128xf32>
    %110 = vector.broadcast %108 : vector<1x1x128xf32> to vector<1x8x128xf32>
    %111 = arith.mulf %110, %109 : vector<1x8x128xf32>
    %112 = arith.addf %107, %111 : vector<1x8x128xf32>
    %113 = arith.addf %85, %112 : vector<1x8x128xf32>
    %c0_i32 = arith.constant 0 : i32
    %114 = arith.cmpi eq, %arg2, %c0_i32 : i32
    %115 = arith.extui %114 : i1 to i32
    %c0_i32_44 = arith.constant 0 : i32
    %116 = arith.cmpi ne, %115, %c0_i32_44 : i32
    scf.if %116 {
      %c0_47 = arith.constant 0 : index
      %c0_48 = arith.constant 0 : index
      %c0_49 = arith.constant 0 : index
      %120 = vector.load %arg5[%c0_47, %c0_48, %c0_49] : memref<1x8x256xf32, #tpu.memory_space<vmem>>, vector<1x8x128xf32>
      tpu.vector_store %arg5[%c0_47, %c0_48, %c0_49], %103 {strides = array<i32>} : memref<1x8x256xf32, #tpu.memory_space<vmem>>, vector<1x8x128xf32>,
      %c0_50 = arith.constant 0 : index
      %c0_51 = arith.constant 0 : index
      %c128_52 = arith.constant 128 : index
      %121 = vector.load %arg5[%c0_50, %c0_51, %c128_52] : memref<1x8x256xf32, #tpu.memory_space<vmem>>, vector<1x8x128xf32>
      tpu.vector_store %arg5[%c0_50, %c0_51, %c128_52], %113 {strides = array<i32>} : memref<1x8x256xf32, #tpu.memory_space<vmem>>, vector<1x8x128xf32>,
    } else {
    }
    %c0_i32_45 = arith.constant 0 : i32
    %117 = arith.cmpi ne, %arg2, %c0_i32_45 : i32
    %118 = arith.extui %117 : i1 to i32
    %c0_i32_46 = arith.constant 0 : i32
    %119 = arith.cmpi ne, %118, %c0_i32_46 : i32
    scf.if %119 {
      %c0_47 = arith.constant 0 : index
      %c0_48 = arith.constant 0 : index
      %c0_49 = arith.constant 0 : index
      %120 = vector.load %arg5[%c0_47, %c0_48, %c0_49] : memref<1x8x256xf32, #tpu.memory_space<vmem>>, vector<1x8x128xf32>
      %121 = arith.addf %120, %103 : vector<1x8x128xf32>
      %c0_50 = arith.constant 0 : index
      %c0_51 = arith.constant 0 : index
      %c0_52 = arith.constant 0 : index
      %122 = vector.load %arg5[%c0_50, %c0_51, %c0_52] : memref<1x8x256xf32, #tpu.memory_space<vmem>>, vector<1x8x128xf32>
      tpu.vector_store %arg5[%c0_50, %c0_51, %c0_52], %121 {strides = array<i32>} : memref<1x8x256xf32, #tpu.memory_space<vmem>>, vector<1x8x128xf32>,
      %c0_53 = arith.constant 0 : index
      %c0_54 = arith.constant 0 : index
      %c128_55 = arith.constant 128 : index
      %123 = vector.load %arg5[%c0_53, %c0_54, %c128_55] : memref<1x8x256xf32, #tpu.memory_space<vmem>>, vector<1x8x128xf32>
      %124 = arith.addf %123, %113 : vector<1x8x128xf32>
      %c0_56 = arith.constant 0 : index
      %c0_57 = arith.constant 0 : index
      %c128_58 = arith.constant 128 : index
      %125 = vector.load %arg5[%c0_56, %c0_57, %c128_58] : memref<1x8x256xf32, #tpu.memory_space<vmem>>, vector<1x8x128xf32>
      tpu.vector_store %arg5[%c0_56, %c0_57, %c128_58], %124 {strides = array<i32>} : memref<1x8x256xf32, #tpu.memory_space<vmem>>, vector<1x8x128xf32>,
    } else {
    }
    return
  }
  func.func @transform_0(%arg0: i32, %arg1: i32, %arg2: i32) -> (i32, i32, i32) {
    %c0_i32 = arith.constant 0 : i32
    %c0_i32_0 = arith.constant 0 : i32
    return %arg0, %arg2, %c0_i32 : i32, i32, i32
  }
  func.func @transform_1(%arg0: i32, %arg1: i32, %arg2: i32) -> (i32, i32, i32) {
    %c0_i32 = arith.constant 0 : i32
    %c0_i32_0 = arith.constant 0 : i32
    return %arg2, %arg1, %c0_i32 : i32, i32, i32
  }
  func.func @transform_2(%arg0: i32, %arg1: i32, %arg2: i32) -> (i32, i32, i32) {
    %c0_i32 = arith.constant 0 : i32
    %c0_i32_0 = arith.constant 0 : i32
    return %arg0, %arg1, %c0_i32 : i32, i32, i32
  }
}

</mosaic_0001>

<bundles_post_ra>
// kernel: reverse.0
= control target key start
LH: loop header
LB: loop body
LE: loop exit
PB: predicated region body
PF: predicated region fallthrough
CT: control target
= control target key end

     0   :  { %v71_v3 = vlaneseq  ;;  %v64_v9 = vld [vmem:[#allocation0 + $0x7] ss:$-1 sm:$0xff]  ;;  %v78_v12 = vld [vmem:[#allocation0 + $0x17] ss:$-1 sm:$0xff]  ;;  %s329_s0 = inlined_call_operand.vmem [shape: f32[2,4,16,7], index: 0, kind: input, shape index: {}]   ;;  %s330_s1 = inlined_call_operand.vmem [shape: f32[2,4,16,7], index: 1, kind: output, shape index: {}]  }
   0x1   :  { %v44_v0 = vld [vmem:[%s329_s0] sm:$0xff]  ;;  %v46_v1 = vld [vmem:[%s329_s0 + $0x8] sm:$0xff]  ;;  %v48_v2 = vld [vmem:[%s329_s0 + $0x10] sm:$0xff]  ;;  %v65_v10 = vrot.slane %v64_v9, 1  ;;  %v79_v14 = vrot.slane %v78_v12, 1 }
   0x2   :  { %45 = vst [vmem:[#allocation0 + $0x8] sm:$0xff] %v44_v0  ;;  %47 = vst [vmem:[#allocation0 + $0x18] sm:$0xff] %v46_v1  ;;  %v50_v4 = vld [vmem:[%s329_s0 + $0x18] sm:$0xff]  ;;  %v52_v5 = vld [vmem:[%s329_s0 + $0x20] sm:$0xff]  ;;  %v72_v11 = vshrl.u32 %v71_v3, 7 }
   0x3   :  { %49 = vst [vmem:[#allocation0 + $0x28] sm:$0xff] %v48_v2  ;;  %v54_v6 = vld [vmem:[%s329_s0 + $0x28] sm:$0xff]  ;;  %51 = vst [vmem:[#allocation0 + $0x38] sm:$0xff] %v50_v4  ;;  %v56_v7 = vld [vmem:[%s329_s0 + $0x30] sm:$0xff] }
   0x4   :  { %53 = vst [vmem:[#allocation0 + $0x48] sm:$0xff] %v52_v5  ;;  %55 = vst [vmem:[#allocation0 + $0x58] sm:$0xff] %v54_v6  ;;  %v58_v8 = vld [vmem:[%s329_s0 + $0x38] sm:$0xff]  ;;  %v92_v13 = vld [vmem:[#allocation0 + $0x27] ss:$-1 sm:$0xff]  ;;  %vm73_vm0 = vcmp.lt.s32.totalorder %v72_v11, 7 }
   0x5   :  { %57 = vst [vmem:[#allocation0 + $0x68] sm:$0xff] %v56_v7  ;;  %59 = vst [vmem:[#allocation0 + $0x78] sm:$0xff] %v58_v8  ;;  %v93_v15 = vrot.slane %v92_v13, 1  ;;  %v106_v16 = vld [vmem:[#allocation0 + $0x37] ss:$-1 sm:$0xff] }
   0x6   :  { %66 = vst [vmem:[#allocation1] sm:$0xff] %v65_v10  ;;  %v107_v17 = vrot.slane %v106_v16, 1  ;;  %v120_v18 = vld [vmem:[#allocation0 + $0x47] ss:$-1 sm:$0xff]  ;;  %v134_v19 = vld [vmem:[#allocation0 + $0x57] ss:$-1 sm:$0xff] }
   0x7   :  { %80 = vst [vmem:[#allocation1 + $0x8] sm:$0xff] %v79_v14  ;;  %94 = vst [vmem:[#allocation1 + $0x10] sm:$0xff] %v93_v15  ;;  %v121_v20 = vrot.slane %v120_v18, 1  ;;  %v135_v21 = vrot.slane %v134_v19, 1  ;;  %v148_v22 = vld [vmem:[#allocation0 + $0x67] ss:$-1 sm:$0xff] }
   0x8   :  { %v162_v23 = vld [vmem:[#allocation0 + $0x77] ss:$-1 sm:$0xff]  ;;  %108 = vst [vmem:[#allocation1 + $0x18] sm:$0xff] %v107_v17  ;;  %v149_v24 = vrot.slane %v148_v22, 1 }
   0x9   :  { %v163_v25 = vrot.slane %v162_v23, 1  ;;  %v69_v26 = vld [vmem:[#allocation0 + $0xf] ss:$-1 sm:$0xff]  ;;  %v83_v27 = vld [vmem:[#allocation0 + $0x1f] ss:$-1 sm:$0xff]  ;;  %122 = vst [vmem:[#allocation1 + $0x20] sm:$0xff] %v121_v20 }
   0xa   :  { %v97_v28 = vld [vmem:[#allocation0 + $0x2f] ss:$-1 sm:$0xff]  ;;  %136 = vst [vmem:[#allocation1 + $0x28] sm:$0xff] %v135_v21  ;;  %v70_v29 = vrot.slane %v69_v26, 1  ;;  %v84_v30 = vrot.slane %v83_v27, 1  ;;  %150 = vst [vmem:[#allocation1 + $0x30] sm:$0xff] %v149_v24 }
   0xb   :  { %v98_v31 = vrot.slane %v97_v28, 1  ;;  %v111_v32 = vld [vmem:[#allocation0 + $0x3f] ss:$-1 sm:$0xff]  ;;  %164 = vst [vmem:[#allocation1 + $0x38] sm:$0xff] %v163_v25  ;;  %v125_v34 = vld [vmem:[#allocation0 + $0x4f] ss:$-1 sm:$0xff] }
   0xc   :  { %v112_v33 = vrot.slane %v111_v32, 1  ;;  %v139_v35 = vld [vmem:[#allocation0 + $0x5f] ss:$-1 sm:$0xff]  ;;  %74 = vst.msk [vmem:[#allocation1] sm:$0xff] %vm73_vm0, %v70_v29  ;;  %88 = vst.msk [vmem:[#allocation1 + $0x8] sm:$0xff] %vm73_vm0, %v84_v30  ;;  %v126_v36 = vrot.slane %v125_v34, 1 }
   0xd   :  { %102 = vst.msk [vmem:[#allocation1 + $0x10] sm:$0xff] %vm73_vm0, %v98_v31  ;;  %v140_v37 = vrot.slane %v139_v35, 1  ;;  %v153_v38 = vld [vmem:[#allocation0 + $0x6f] ss:$-1 sm:$0xff]  ;;  %v167_v39 = vld [vmem:[#allocation0 + $0x7f] ss:$-1 sm:$0xff] }
   0xe   :  { %116 = vst.msk [vmem:[#allocation1 + $0x18] sm:$0xff] %vm73_vm0, %v112_v33  ;;  %v154_v40 = vrot.slane %v153_v38, 1  ;;  %v168_v41 = vrot.slane %v167_v39, 1  ;;  %130 = vst.msk [vmem:[#allocation1 + $0x20] sm:$0xff] %vm73_vm0, %v126_v36 }
   0xf   :  { %144 = vst.msk [vmem:[#allocation1 + $0x28] sm:$0xff] %vm73_vm0, %v140_v37 }
  0x10   :  { %158 = vst.msk [vmem:[#allocation1 + $0x30] sm:$0xff] %vm73_vm0, %v154_v40  ;;  %172 = vst.msk [vmem:[#allocation1 + $0x38] sm:$0xff] %vm73_vm0, %v168_v41 }
  0x13   :  { %v214_v42 = vld [vmem:[#allocation1] sm:$0xff]  ;;  %v216_v43 = vld [vmem:[#allocation1 + $0x8] sm:$0xff] }
  0x14   :  { %v218_v44 = vld [vmem:[#allocation1 + $0x10] sm:$0xff]  ;;  %215 = vst [vmem:[%s330_s1] sm:$0xff] %v214_v42  ;;  %217 = vst [vmem:[%s330_s1 + $0x8] sm:$0xff] %v216_v43 }
  0x15   :  { %219 = vst [vmem:[%s330_s1 + $0x10] sm:$0xff] %v218_v44  ;;  %v220_v45 = vld [vmem:[#allocation1 + $0x18] sm:$0xff]  ;;  %v222_v46 = vld [vmem:[#allocation1 + $0x20] sm:$0xff] }
  0x16   :  { %221 = vst [vmem:[%s330_s1 + $0x18] sm:$0xff] %v220_v45  ;;  %v224_v47 = vld [vmem:[#allocation1 + $0x28] sm:$0xff]  ;;  %223 = vst [vmem:[%s330_s1 + $0x20] sm:$0xff] %v222_v46 }
  0x17   :  { %225 = vst [vmem:[%s330_s1 + $0x28] sm:$0xff] %v224_v47  ;;  %v226_v48 = vld [vmem:[#allocation1 + $0x30] sm:$0xff]  ;;  %v228_v49 = vld [vmem:[#allocation1 + $0x38] sm:$0xff] }
  0x18   :  { %227 = vst [vmem:[%s330_s1 + $0x30] sm:$0xff] %v226_v48  ;;  %229 = vst [vmem:[%s330_s1 + $0x38] sm:$0xff] %v228_v49 }

// kernel: _lambda_.1
= control target key start
LH: loop header
LB: loop body
LE: loop exit
PB: predicated region body
PF: predicated region fallthrough
CT: control target
= control target key end

     0   :  { %s536_s9 = smov 0   ;;  %s538_s10 = smov 0   ;;  %s597_s0 = inlined_call_operand.vmem [shape: f32[2,4,256], index: 0, kind: input, shape index: {}]   ;;  %s598_s1 = inlined_call_operand.vmem [shape: f32[4,8,256], index: 1, kind: input, shape index: {}]   ;;  %s599_s2 = inlined_call_operand.vmem [shape: f32[2,8,256], index: 2, kind: output, shape index: {}]  }
   0x1   :  { %s540_s11 = smov 0  }
   0x2 LB: > { %s31_s12 = sadd.s32 1, %s515_s10  ;;  %p450_p0 = scmp.ge.s32.totalorder %s519_s11, 1  ;;  %s519_s11 = sphi %s540_s11, %s12_s11   ;;  %s515_s10 = sphi %s538_s10, %s601_s10   ;;  %s511_s9 = sphi %s536_s9, %s600_s9  }
   0x3   : > { %p33_p1 = scmp.ge.s32.totalorder %s31_s12, 2  ;;  %p157_p2 = scmp.lt.s32.totalorder %s519_s11, 3 }
   0x5   : > { %s603_s12 = smov (%p33_p1, %s31_s12), 0  ;;  %p158_p3 = pnand %p450_p0, %p157_p2 }
   0x6   : > { %p197_p4 = scmp.lt.s32.totalorder (!%p158_p3), %s511_s9, 1  ;;  %v228_v0 = vld [vmem:[%s598_s1] sm:$0xff] (!%p158_p3)  ;;  %v229_v1 = vld [vmem:[%s598_s1 + $0x8] sm:$0xff] (!%p158_p3)  ;;  %v457_v2 = vld [vmem:[%s598_s1 + $0x10] sm:$0xff] (!%p158_p3) }
   0x7   : > { %161 = sbr.rel (%p158_p3) target bundleno = 32 (0x20), region = 28  ;;  %v458_v3 = vld [vmem:[%s598_s1 + $0x18] sm:$0xff] (!%p158_p3)  ;;  %v461_v4 = vld [vmem:[%s598_s1 + $0x20] sm:$0xff] (!%p158_p3)  ;;  %v462_v5 = vld [vmem:[%s598_s1 + $0x28] sm:$0xff] (!%p158_p3) }
   0x8   : > { %v465_v6 = vld [vmem:[%s598_s1 + $0x30] sm:$0xff] (!%p158_p3)  ;;  %v466_v7 = vld [vmem:[%s598_s1 + $0x38] sm:$0xff] (!%p158_p3) }
   0xe   : > { %s605_s9 = smov (!%p197_p4, %s511_s9), 1 }
   0xf   : > { %s471_s17 = sshll.u32 %s605_s9, 3  ;;  %s472_s5 = sshll.u32 %s605_s9, 4 }
  0x10   : > { %s205_s26 = scalar_lea.vmem %s597_s0, %s471_s17  ;;  %s225_s8 = scalar_lea.vmem %s599_s2, %s472_s5 }
  0x11   : > { %v455_v8 = vld [vmem:[%s205_s26] ss:$0 sm:$0xff]  ;;  %v456_v9 = vld [vmem:[%s205_s26 + $0x4] ss:$0 sm:$0xff]  ;;  %v459_v10 = vld [vmem:[%s205_s26 + $0x1] ss:$0 sm:$0xff] }
  0x12   : > { %v234_v11 = vmul.f32 %v455_v8, %v228_v0  ;;  %v239_v12 = vmul.f32 %v456_v9, %v229_v1  ;;  %v460_v13 = vld [vmem:[%s205_s26 + $0x5] ss:$0 sm:$0xff]  ;;  %v255_v14 = vmul.f32 %v459_v10, %v457_v2  ;;  %v463_v15 = vld [vmem:[%s205_s26 + $0x2] ss:$0 sm:$0xff]  ;;  %v464_v16 = vld [vmem:[%s205_s26 + $0x6] ss:$0 sm:$0xff]  ;;  %v242_v17 = vmul.f32 %v455_v8, %v229_v1 }
  0x13   : > { %v260_v18 = vmul.f32 %v460_v13, %v458_v3  ;;  %v276_v19 = vmul.f32 %v463_v15, %v461_v4  ;;  %v281_v20 = vmul.f32 %v464_v16, %v462_v5  ;;  %v467_v21 = vld [vmem:[%s205_s26 + $0x3] ss:$0 sm:$0xff]  ;;  %v468_v22 = vld [vmem:[%s205_s26 + $0x7] ss:$0 sm:$0xff]  ;;  %v243_v23 = vmul.f32 %v456_v9, %v228_v0 }
  0x14   : > { %v240_v24 = vsub.f32 %v234_v11, %v239_v12  ;;  %v297_v25 = vmul.f32 %v467_v21, %v465_v6  ;;  %v302_v26 = vmul.f32 %v468_v22, %v466_v7  ;;  %v263_v27 = vmul.f32 %v459_v10, %v458_v3 }
  0x15   : > { %v261_v28 = vsub.f32 %v255_v14, %v260_v18  ;;  %v282_v29 = vsub.f32 %v276_v19, %v281_v20  ;;  %v244_v30 = vadd.f32 %v243_v23, %v242_v17  ;;  %v264_v31 = vmul.f32 %v460_v13, %v457_v2 }
  0x16   : > { %v284_v32 = vmul.f32 %v463_v15, %v462_v5  ;;  %v285_v33 = vmul.f32 %v464_v16, %v461_v4  ;;  %v305_v34 = vmul.f32 %v467_v21, %v466_v7  ;;  %v303_v36 = vsub.f32 %v297_v25, %v302_v26 }
  0x17   : > { %v262_v35 = vadd.f32 %v261_v28, %v240_v24  ;;  %v265_v37 = vadd.f32 %v264_v31, %v263_v27  ;;  %v306_v38 = vmul.f32 %v468_v22, %v465_v6 }
  0x18   : > { %v286_v39 = vadd.f32 %v285_v33, %v284_v32 }
  0x19   : > { %v283_v40 = vadd.f32 %v282_v29, %v262_v35  ;;  %v266_v41 = vadd.f32 %v265_v37, %v244_v30  ;;  %v307_v42 = vadd.f32 %v306_v38, %v305_v34 }
  0x1b   : > { %v304_v43 = vadd.f32 %v303_v36, %v283_v40  ;;  %v287_v44 = vadd.f32 %v286_v39, %v266_v41 }
  0x1d   : > { %313 = vst [vmem:[%s225_s8] sm:$0xff] %v304_v43  ;;  %v308_v45 = vadd.f32 %v307_v42, %v287_v44 }
  0x1f   : > { %314 = vst [vmem:[%s225_s8 + $0x8] sm:$0xff] %v308_v45 }
  0x20 PF: > { %s12_s11 = sadd.s32 1, %s519_s11   ;;  %s600_s9 = smov %s515_s10 }
  0x21   : > { %p9_p5 = scmp.ge.s32.totalorder %s12_s11, 4   ;;  %s601_s10 = smov %s603_s12 }
  0x23   :  { %11 = sbr.rel (!%p9_p5) target bundleno = 2 (0x2), region = 72 }

</bundles_post_ra>
